<compile_context>
chip_gen: v5e
topology: v5e:2x2
jax: 0.10.0
libtpu: 0.0.40
codegen_flags: <defaults>
</compile_context>

<pallas_src>
import jax
import jax.numpy as jnp
from jax.experimental import pallas as pl
from jax.experimental.pallas import tpu as pltpu


# ---------------------------------------------------------------------------
# Kernel
# ---------------------------------------------------------------------------
def middle_score_kernel(x_ref, hp_ref, w_e_ref, w_s_ref, out_ref):
    # x_ref:   (1, TL, E)    bf16  -- num_embeddings row tile
    # hp_ref:  (1, 1, 3Hp)   f32   -- per-batch hidden projection (+ bias)
    # w_e_ref: (E, 3Hp)      bf16  -- fused [attn|attn_left|attn_right] (emb part)
    # w_s_ref: (3Hp, 128)    f32   -- block-diag score heads in columns 0..2
    # out_ref: (1, TL, 128)  f32
    x = x_ref[0]                                              # (TL, E) bf16
    hp = hp_ref[0]                                            # (1, 3Hp) f32
    acc = jnp.dot(x, w_e_ref[...],
                  preferred_element_type=jnp.float32)         # (TL, 3Hp) f32 acc
    h = jnp.tanh(acc + hp)                                    # bias/tanh in f32
    out_ref[0] = jnp.dot(h, w_s_ref[...],
                         preferred_element_type=jnp.float32
                         ).astype(out_ref.dtype)              # (TL, 128) lane-dense


# ---------------------------------------------------------------------------
# One-time parameter fusion (NOT redone per call)
# ---------------------------------------------------------------------------
def _round_up(x, m):
    return ((x + m - 1) // m) * m


def prepare_fused_params(params, lane_pad=256):
    """Split/fuse the six Linears into kernel-friendly, MXU-padded weights."""
    H, K = params["attn_w"].shape
    E = K - H
    H3 = 3 * H
    H3p = _round_up(H3, lane_pad)   # multiple of 256 -> full MXU tiles (v6e/v7x)

    heads_w = [params["attn_w"], params["attn_left_w"], params["attn_right_w"]]
    heads_b = [params["attn_b"], params["attn_left_b"], params["attn_right_b"]]
    score_w = [params["score_w"], params["score_left_w"], params["score_right_w"]]

    w_h = jnp.zeros((H, H3p), jnp.float32)      # hidden part (stays wrapper-side)
    w_e = jnp.zeros((E, H3p), jnp.float32)      # embedding part (kernel, bf16)
    b = jnp.zeros((H3p,), jnp.float32)
    w_s = jnp.zeros((H3p, 128), jnp.float32)    # lane-dense head: cols 0..2 nonzero
    for j in range(3):
        w_h = w_h.at[:, j * H:(j + 1) * H].set(heads_w[j][:, :H].T)
        w_e = w_e.at[:, j * H:(j + 1) * H].set(heads_w[j][:, H:].T)
        b = b.at[j * H:(j + 1) * H].set(heads_b[j])
        w_s = w_s.at[j * H:(j + 1) * H, j].set(score_w[j][0])

    return {
        "w_h": w_h,                        # f32   (H, 3Hp)
        "w_e": w_e.astype(jnp.bfloat16),   # bf16  (E, 3Hp)  -- halves HBM traffic
        "b": b,                            # f32   (3Hp,)
        "w_score": w_s,                    # f32   (3Hp, 128)
        "hidden_size": H,
        "input_size": E,
    }


# ---------------------------------------------------------------------------
# Forward wrapper
# ---------------------------------------------------------------------------
def _choose_row_tile(max_len, E, H3p, budget_bytes=12 * 1024 * 1024):
    """Largest row tile whose double-buffered footprint fits every gen's
    default scoped VMEM (16 MiB v5e / 32 MiB v6e,v7x; 64 MiB physical v7x)."""
    cap = _round_up(max_len, 8)
    weights = E * H3p * 2 + H3p * 128 * 4 + H3p * 4
    for tl in (1024, 512, 256, 128, 64, 32, 16, 8):
        if tl > cap:
            continue
        per_step = tl * E * 2 + tl * 128 * 4          # bf16 input + f32 output tile
        if 2 * (per_step + weights) <= budget_bytes:
            return tl
    return 8


def middle_score_forward(fused, hidden, num_embeddings, num_mask=None):
    """Mirrors Middle_Score.forward.

    hidden:         (B, 1, hidden_size) f32
    num_embeddings: (B, max_len, input_size) f32
    num_mask:       optional (B, max_len) bool
    returns:        (B, max_len, 3) f32 == cat([score, score_left, score_right], 2)
    """
    B, max_len, E = num_embeddings.shape
    H3p = fused["w_e"].shape[1]

    # Tiny (B, 3Hp) matmul wrapper-side: hidden contraction + bias, done once
    # per batch row instead of once per (b, t) row.
    hidden_proj = (hidden[:, 0, :].astype(jnp.float32) @ fused["w_h"]
                   + fused["b"][None, :])[:, None, :]          # (B, 1, 3Hp) f32

    # Row tiling over max_len (padded to a multiple of the tile).
    TL = _choose_row_tile(max_len, E, H3p)
    L_pad = _round_up(max_len, TL)
    x = num_embeddings
    if L_pad != max_len:
        x = jnp.pad(x, ((0, 0), (0, L_pad - max_len), (0, 0)))
    x = x.astype(jnp.bfloat16)                                  # bf16 kernel input

    grid = (B, L_pad // TL)                                     # >= 2 steps (v7x TCs)
    vmem = pltpu.MemorySpace.VMEM

    out = pl.pallas_call(
        middle_score_kernel,
        grid=grid,
        in_specs=[
            pl.BlockSpec((1, TL, E), lambda b, t: (b, t, 0), memory_space=vmem),
            pl.BlockSpec((1, 1, H3p), lambda b, t: (b, 0, 0), memory_space=vmem),
            pl.BlockSpec((E, H3p), lambda b, t: (0, 0), memory_space=vmem),
            pl.BlockSpec((H3p, 128), lambda b, t: (0, 0), memory_space=vmem),
        ],
        out_specs=pl.BlockSpec((1, TL, 128), lambda b, t: (b, t, 0),
                               memory_space=vmem),
        out_shape=jax.ShapeDtypeStruct((B, L_pad, 128), jnp.float32),
        compiler_params=pltpu.CompilerParams(
            dimension_semantics=("parallel", "parallel"),
            vmem_limit_bytes=32 * 1024 * 1024,
        ),
    )(x, hidden_proj, fused["w_e"], fused["w_score"])

    # Lane-dense kernel output -> final (B, max_len, 3); mask fuses into this slice.
    score_middle = out[:, :max_len, :3]
    if num_mask is not None:
        score_middle = jnp.where(num_mask[:, :, None],
                                 jnp.float32(-1.0e12), score_middle)
    return score_middle


# ---------------------------------------------------------------------------
# PyTorch-style init (nn.Linear layout: weight (out, in), U(-1/sqrt(in), 1/sqrt(in)))
# ---------------------------------------------------------------------------
def init_params(key, input_size, hidden_size):
    ks = jax.random.split(key, 9)
    K = hidden_size + input_size
    s_attn = 1.0 / jnp.sqrt(jnp.float32(K))
    s_score = 1.0 / jnp.sqrt(jnp.float32(hidden_size))
    u = jax.random.uniform
    return {
        "attn_w": u(ks[0], (hidden_size, K), jnp.float32, -s_attn, s_attn),
        "attn_b": u(ks[1], (hidden_size,), jnp.float32, -s_attn, s_attn),
        "attn_left_w": u(ks[2], (hidden_size, K), jnp.float32, -s_attn, s_attn),
        "attn_left_b": u(ks[3], (hidden_size,), jnp.float32, -s_attn, s_attn),
        "attn_right_w": u(ks[4], (hidden_size, K), jnp.float32, -s_attn, s_attn),
        "attn_right_b": u(ks[5], (hidden_size,), jnp.float32, -s_attn, s_attn),
        "score_w": u(ks[6], (1, hidden_size), jnp.float32, -s_score, s_score),
        "score_left_w": u(ks[7], (1, hidden_size), jnp.float32, -s_score, s_score),
        "score_right_w": u(ks[8], (1, hidden_size), jnp.float32, -s_score, s_score),
    }


if __name__ == "__main__":
    B = 2
    MAX_LEN = 8
    INPUT_SIZE = 32
    HIDDEN_SIZE = 32

    key = jax.random.PRNGKey(0)
    kp, kh, kn = jax.random.split(key, 3)

    params = init_params(kp, INPUT_SIZE, HIDDEN_SIZE)
    fused = prepare_fused_params(params)          # one-time fusion / padding

    hidden = jax.random.normal(kh, (B, 1, HIDDEN_SIZE), jnp.float32)
    num_embeddings = jax.random.normal(kn, (B, MAX_LEN, INPUT_SIZE), jnp.float32)
    # Mask the last two positions of every row (mirrors torch masked_fill_).
    num_mask = jnp.broadcast_to(
        jnp.arange(MAX_LEN)[None, :] >= (MAX_LEN - 2), (B, MAX_LEN))

    score_middle = middle_score_forward(fused, hidden, num_embeddings, num_mask)
    jax.block_until_ready(score_middle)

    # Pure-JAX reference of the PyTorch math, using the same numeric choices as
    # the kernel (hidden contraction in f32, embeddings / W_e path in bf16 with
    # f32 accumulation), built directly from the per-head parameters.
    x_bf = num_embeddings.astype(jnp.bfloat16).astype(jnp.float32)
    h0 = hidden[:, 0, :]

    def head(w, b, ws):
        w_h = w[:, :HIDDEN_SIZE]                                     # hidden part
        w_e = w[:, HIDDEN_SIZE:].astype(jnp.bfloat16).astype(jnp.float32)
        hp = h0 @ w_h.T + b                                          # (B, H)
        t = jnp.tanh(jnp.einsum("ble,he->blh", x_bf, w_e) + hp[:, None, :])
        return jnp.einsum("blh,h->bl", t, ws[0])                     # (B, L)

    ref = jnp.stack(
        [head(params["attn_w"], params["attn_b"], params["score_w"]),
         head(params["attn_left_w"], params["attn_left_b"], params["score_left_w"]),
         head(params["attn_right_w"], params["attn_right_b"], params["score_right_w"])],
        axis=2)
    ref = jnp.where(num_mask[:, :, None], jnp.float32(-1.0e12), ref)

    assert score_middle.shape == (B, MAX_LEN, 3)
    assert jnp.allclose(score_middle, ref, atol=5e-3, rtol=5e-3), \
        "score_middle mismatch"

    print("KERNEL_OK")
</pallas_src>

<mosaic_0001>
module attributes {stable_mosaic.version = 11 : i64} {
  func.func @middle_score_kernel(%arg0: i32, %arg1: i32, %arg2: memref<1x8x32xbf16, #tpu.memory_space<vmem>>, %arg3: memref<1x1x256xf32, #tpu.memory_space<vmem>>, %arg4: memref<32x256xbf16, #tpu.memory_space<vmem>>, %arg5: memref<256x128xf32, #tpu.memory_space<vmem>>, %arg6: memref<1x8x128xf32, #tpu.memory_space<vmem>>) attributes {dimension_semantics = [#tpu.dimension_semantics<parallel>, #tpu.dimension_semantics<parallel>], iteration_bounds = array<i64: 2, 1>, scalar_prefetch = 0 : i64, scratch_operands = 0 : i64, tpu.core_type = #tpu.core_type<tc>, window_params = [{transform_indices = @transform_0, window_bounds = array<i64: 1, 8, 32>}, {transform_indices = @transform_1, window_bounds = array<i64: 1, 1, 256>}, {pipeline_mode = #tpu.pipeline_mode<synchronous>, transform_indices = @transform_2, window_bounds = array<i64: 32, 256>}, {pipeline_mode = #tpu.pipeline_mode<synchronous>, transform_indices = @transform_3, window_bounds = array<i64: 256, 128>}, {transform_indices = @transform_4, window_bounds = array<i64: 1, 8, 128>}]} {
    %c0 = arith.constant 0 : index
    %c0_0 = arith.constant 0 : index
    %c0_1 = arith.constant 0 : index
    %0 = vector.load %arg2[%c0, %c0_0, %c0_1] : memref<1x8x32xbf16, #tpu.memory_space<vmem>>, vector<1x8x32xbf16>
    %1 = vector.shape_cast %0 : vector<1x8x32xbf16> to vector<8x32xbf16>
    %c0_2 = arith.constant 0 : index
    %c0_3 = arith.constant 0 : index
    %c0_4 = arith.constant 0 : index
    %2 = vector.load %arg3[%c0_2, %c0_3, %c0_4] : memref<1x1x256xf32, #tpu.memory_space<vmem>>, vector<1x1x256xf32>
    %3 = vector.shape_cast %2 : vector<1x1x256xf32> to vector<1x256xf32>
    %c0_5 = arith.constant 0 : index
    %c0_6 = arith.constant 0 : index
    %4 = vector.load %arg4[%c0_5, %c0_6] : memref<32x256xbf16, #tpu.memory_space<vmem>>, vector<32x256xbf16>
    %cst = arith.constant dense<0.000000e+00> : vector<8x256xf32>
    %5 = tpu.matmul %1, %4, %cst {dimension_numbers = #tpu.dot_dimension_numbers<[1], [0], [0], [1], [0, 0, 1, 1], [], []>} : vector<8x32xbf16>, vector<32x256xbf16>, vector<8x256xf32> -> vector<8x256xf32>
    %6 = vector.broadcast %3 : vector<1x256xf32> to vector<8x256xf32>
    %7 = arith.addf %5, %6 : vector<8x256xf32>
    %8 = math.tanh %7 : vector<8x256xf32>
    %c0_7 = arith.constant 0 : index
    %c0_8 = arith.constant 0 : index
    %9 = vector.load %arg5[%c0_7, %c0_8] : memref<256x128xf32, #tpu.memory_space<vmem>>, vector<256x128xf32>
    %cst_9 = arith.constant dense<0.000000e+00> : vector<8x128xf32>
    %10 = tpu.matmul %8, %9, %cst_9 {dimension_numbers = #tpu.dot_dimension_numbers<[1], [0], [0], [1], [0, 0, 1, 1], [], []>} : vector<8x256xf32>, vector<256x128xf32>, vector<8x128xf32> -> vector<8x128xf32>
    %c0_10 = arith.constant 0 : index
    %c0_11 = arith.constant 0 : index
    %c0_12 = arith.constant 0 : index
    %11 = vector.load %arg6[%c0_10, %c0_11, %c0_12] : memref<1x8x128xf32, #tpu.memory_space<vmem>>, vector<1x8x128xf32>
    %12 = vector.shape_cast %11 : vector<1x8x128xf32> to vector<8x128xf32>
    %13 = vector.shape_cast %10 : vector<8x128xf32> to vector<1x8x128xf32>
    tpu.vector_store %arg6[%c0_10, %c0_11, %c0_12], %13 {strides = array<i32>} : memref<1x8x128xf32, #tpu.memory_space<vmem>>, vector<1x8x128xf32>,
    return
  }
  func.func @transform_0(%arg0: i32, %arg1: i32) -> (i32, i32, i32) {
    %c0_i32 = arith.constant 0 : i32
    %c0_i32_0 = arith.constant 0 : i32
    return %arg0, %arg1, %c0_i32 : i32, i32, i32
  }
  func.func @transform_1(%arg0: i32, %arg1: i32) -> (i32, i32, i32) {
    %c0_i32 = arith.constant 0 : i32
    %c0_i32_0 = arith.constant 0 : i32
    %c0_i32_1 = arith.constant 0 : i32
    return %arg0, %c0_i32, %c0_i32_0 : i32, i32, i32
  }
  func.func @transform_2(%arg0: i32, %arg1: i32) -> (i32, i32) {
    %c0_i32 = arith.constant 0 : i32
    %c0_i32_0 = arith.constant 0 : i32
    %c0_i32_1 = arith.constant 0 : i32
    return %c0_i32, %c0_i32_0 : i32, i32
  }
  func.func @transform_3(%arg0: i32, %arg1: i32) -> (i32, i32) {
    %c0_i32 = arith.constant 0 : i32
    %c0_i32_0 = arith.constant 0 : i32
    %c0_i32_1 = arith.constant 0 : i32
    return %c0_i32, %c0_i32_0 : i32, i32
  }
  func.func @transform_4(%arg0: i32, %arg1: i32) -> (i32, i32, i32) {
    %c0_i32 = arith.constant 0 : i32
    %c0_i32_0 = arith.constant 0 : i32
    return %arg0, %arg1, %c0_i32 : i32, i32, i32
  }
}

</mosaic_0001>

<bundles_post_ra>
// kernel: tpu_custom_call.1
= control target key start
LH: loop header
LB: loop body
LE: loop exit
PB: predicated region body
PF: predicated region fallthrough
CT: control target
= control target key end

     0   :  { %s1129_s0 = inlined_call_operand.hbm [shape: bf16[2,8,32], index: 0, kind: input, shape index: {}]   ;;  %s1130_s1 = inlined_call_operand.hbm [shape: f32[2,1,256], index: 1, kind: input, shape index: {}]   ;;  %s1131_s2 = inlined_call_operand.hbm [shape: bf16[32,256], index: 2, kind: input, shape index: {}]   ;;  %s1132_s3 = inlined_call_operand.hbm [shape: f32[256,128], index: 3, kind: input, shape index: {}]   ;;  %s1133_s4 = inlined_call_operand.hbm [shape: f32[2,8,128], index: 4, kind: output, shape index: {}]  }
   0x1   :  { %1137 = sst [smem:[#allocation20_spill]] %s1131_s2 }
   0x2   :  { %1138 = sst [smem:[#allocation21_spill]] %s1132_s3 }
   0x3   :  { %9 = vsyncpa [#allocation3], 0 }
   0x4   :  { %11 = vsyncpa [#allocation3 + $0x1], 0 }
   0x5   :  { %12 = vsyncpa [#allocation6], 0 }
   0x6   :  { %14 = vsyncpa [#allocation6 + $0x1], 0 }
   0x7   :  { %15 = vsyncpa [#allocation9], 0 }
   0x8   :  { %16 = vsyncpa [#allocation4], 0 }
   0x9   :  { %18 = vsyncpa [#allocation4 + $0x1], 0  ;;  %s961_s15 = smov 0   ;;  %s963_s16 = smov 0  }
   0xa   :  { %s965_s17 = smov 0   ;;  %s967_s18 = smov 0  }
   0xb   :  { %s969_s19 = smov 0   ;;  %s971_s20 = smov 0  }
   0xc LB: > { %1139 = sst [smem:[#allocation16_spill]] %s918_s17  ;;  %s992_s21 = sadd.s32 4294967295, %s930_s20   ;;  %s930_s20 = sphi %s971_s20, %s24_s20   ;;  %s926_s19 = sphi %s969_s19, %s1157_s19   ;;  %s922_s18 = sphi %s967_s18, %s1156_s18   ;;  %s918_s17 = sphi %s965_s17, %s1152_s17   ;;  %s914_s16 = sphi %s963_s16, %s1155_s16   ;;  %s910_s15 = sphi %s961_s15, %s1154_s15  }
   0xd   : > { %p582_p0 = scmp.ge.s32.totalorder %s930_s20, 1  ;;  %p59_p1 = scmp.eq.s32.totalorder %s992_s21, 0 }
   0xe   : > { %p165_p2 = scmp.lt.s32.totalorder %s930_s20, 3  ;;  %s1140_s2 = sld [smem:[#allocation20_spill]] }
   0xf   : > { %s932_s26 = smov [#allocation7]   ;;  %p585_p6 = scmp.ge.s32.totalorder %s930_s20, 2 }
  0x10   : > { %p1000_p3 = pnand %p582_p0, %p165_p2  ;;  %s178_s27 = sshll.u32 %s932_s26, 4  ;;  %s179_s27 = int_to_ptr.vmem [resolvable:$true] %s178_s27 }
  0x11   : > { %s1142_s3 = sld [smem:[#allocation21_spill]]  ;;  %s933_s5 = smov 128  }
  0x12   : > { %p636_p4 = pneg %p1000_p3  ;;  %s934_s6 = smov 8  }
  0x13   : > { %s935_s7 = smov [#allocation8]   ;;  %s581_s9 = sadd.s32 4294967294, %s930_s20  }
  0x14   : > { %s176_s24 = sshll.u32 %s1140_s2, 4  ;;  %p637_p5 = pnand %p636_p4, %p59_p1  ;;  %s177_s24 = int_to_ptr.hbm [resolvable:$true] %s176_s24 }
  0x15   : > { %s192_s8 = sshll.u32 %s935_s7, 4  ;;  %s36_s10 = sadd.s32 1, %s926_s19  ;;  %s193_s8 = int_to_ptr.vmem [resolvable:$true] %s192_s8 }
  0x16   : > { %639 = dma.hbm_to_vmem [thread:$0]  (!%p637_p5), %s177_s24, 512, %s179_s27, [#allocation6], %s933_s5, %s933_s5, %s934_s6  }
  0x17   : > { %s190_s30 = sshll.u32 %s1142_s3, 4  ;;  %p38_p7 = scmp.ge.s32.totalorder %s36_s10, 2  ;;  %s191_s30 = int_to_ptr.hbm [resolvable:$true] %s190_s30 }
  0x18   : > { %642 = dma.hbm_to_vmem [thread:$0]  (!%p637_p5), %s191_s30, 4096, %s193_s8, [#allocation9], %s933_s5, %s933_s5, %s934_s6  }
  0x19   : > { %s45_s11 = sadd.s32 1, %s918_s17  ;;  %p52_p8 = scmp.ne.s32.totalorder %s918_s17, %s914_s16 }
  0x1a   : > { %p53_p9 = scmp.eq.s32.totalorder %s930_s20, 0  ;;  %s1159_s10 = smov (%p38_p7, %s36_s10), 0 }
  0x1b   : > { %1143 = sst [smem:[#allocation17_spill]] %s1159_s10  ;;  %p58_p11 = scmp.ne.s32.totalorder %s914_s16, %s910_s15 }
  0x1c   : > { %p1020_p10 = por %p53_p9, %p52_p8  ;;  %s40_s13 = ssub.s32 %s926_s19, %s1159_s10 }
  0x1d   : > { %p152_p12 = scmp.eq.s32.totalorder %s992_s21, 1  ;;  %p43_p13 = scmp.eq.s32.totalorder %s40_s13, 0 }
  0x1e   : > { %p1031_p0 = por %p59_p1, %p58_p11  ;;  %p158_p4 = scmp.eq.s32.totalorder %s581_s9, 1 }
  0x1f   : > { %p1035_p2 = por %p152_p12, %p52_p8  ;;  %p656_p7 = scmp.lt.s32.totalorder %s930_s20, 2 }
  0x20   : > { %s1040_s23 = scalar_select %p43_p13, %s918_s17, %s45_s11  }
  0x21   : > { %p1042_p5 = por %p158_p4, %p58_p11  ;;  %s206_s26 = sand.u32 1, %s918_s17  }
  0x22   : > { %1147 = sst [smem:[#allocation18_spill]] %s1040_s23  ;;  %s587_s27 = sshll.u32 %s926_s19, 2 }
  0x23   : > { %s1148_s24 = scalar_select %p1042_p5, 1, 0 }
  0x24   : > { %s586_s28 = sshll.u32 %s206_s26, 2  ;;  %s215_s5 = scalar_lea.hbm %s1129_s0, %s587_s27 }
  0x25   : > { %1149 = sst [smem:[#allocation19_spill]] %s1148_s24  ;;  %s217_s6 = sshll.u32 %s215_s5, 4  ;;  %s218_s6 = int_to_ptr.hbm [resolvable:$true] %s217_s6 }
  0x26   : > { %s210_s7 = scalar_lea.vmem [#allocation2], %s586_s28  ;;  %p644_p8 = pnand %p656_p7, %p1020_p10 }
  0x27   : > { %s219_s8 = sshll.u32 %s210_s7, 4  ;;  %s226_s9 = sand.u32 1, %s930_s20   ;;  %s220_s8 = int_to_ptr.vmem [resolvable:$true] %s219_s8 }
  0x28   : > { %s588_s11 = sshll.u32 %s206_s26, 1  ;;  %s207_s13 = scalar_lea.sflag [#allocation3], %s206_s26 }
  0x29   : > { %646 = dma.hbm_to_vmem [thread:$0]  (!%p644_p8), %s218_s6, 64, %s220_s8, %s207_s13  }
  0x2a   : > { %s589_s2 = sshll.u32 %s926_s19, 1  ;;  %s230_s3 = scalar_lea.vmem [#allocation5], %s588_s11 }
  0x2b   : > { %s238_s10 = sshll.u32 %s230_s3, 4  ;;  %s234_s24 = scalar_lea.hbm %s1130_s1, %s589_s2  ;;  %s239_s10 = int_to_ptr.vmem [resolvable:$true] %s238_s10 }
  0x2c   : > { %s236_s27 = sshll.u32 %s234_s24, 4  ;;  %s227_s28 = scalar_lea.sflag [#allocation6], %s226_s9  ;;  %s237_s27 = int_to_ptr.hbm [resolvable:$true] %s236_s27 }
  0x2d   : > { %649 = dma.hbm_to_vmem [thread:$0]  (!%p644_p8), %s237_s27, 32, %s239_s10, %s227_s28  }
  0x2e   : > { %247 = sbr.rel (%p1000_p3) target bundleno = 342 (0x156), region = 36  ;;  %s1062_s12 = sand.u32 (!%p1000_p3), 1, %s914_s16  }
  0x2f   : > { %s591_s26 = sshll.u32 (!%p1000_p3), %s1062_s12, 2  ;;  %s250_s3 = scalar_lea.sflag (!%p1000_p3), [#allocation3], %s1062_s12 }
  0x30   : > { %s1066_s29 = scalar_lea.vmem (!%p1000_p3), [#allocation2], %s591_s26 }
  0x33   : > { %889 = dma.done.wait (%p1031_p0), %s250_s3, 64  }
  0x34   : > { %891 = vsyncadd (%p1031_p0), %s250_s3, 4294967232  ;;  %s259_s2 = sand.u32 1, %s992_s21   ;;  %s592_s17 = sshll.u32 %s1062_s12, 1 }
  0x35   : > { %s260_s25 = scalar_lea.sflag [#allocation6], %s259_s2  ;;  %s1074_s10 = scalar_lea.vmem [#allocation5], %s592_s17 }
  0x36   : > { %893 = dma.done.wait (%p1031_p0), %s260_s25, 32  }
  0x37   : > { %895 = vsyncadd (%p1031_p0), %s260_s25, 4294967264 }
  0x38   : > { %897 = dma.done.wait (%p59_p1), [#allocation6], 512  }
  0x39   : > { %899 = vsyncadd (%p59_p1), [#allocation6], 4294966784 }
  0x3a   : > { %901 = dma.done.wait (%p59_p1), [#allocation9], 4096  }
  0x3b   : > { %903 = vsyncadd (%p59_p1), [#allocation9], 4294963200  ;;  %v606_v0 = vld [vmem:[#allocation7 + $0x10] sm:$0xf]  ;;  %v621_v1 = vld [vmem:[#allocation7 + $0x14] sm:$0xf0] }
  0x3c   : > { %v620_v2 = vld [vmem:[#allocation7 + $0x14] sm:$0xf]  ;;  %v607_v3 = vor.u32 %v621_v1, %v606_v0  ;;  %v608_v4 = vld [vmem:[#allocation7 + $0x18] sm:$0xf0]  ;;  %v598_v5 = vld [vmem:[#allocation7] sm:$0xf] }
  0x3d   : > { %v619_v6 = vld [vmem:[#allocation7 + $0x4] sm:$0xf0]  ;;  %v611_v7 = vor.u32 %v620_v2, %v608_v4  ;;  %v618_v8 = vld [vmem:[#allocation7 + $0x4] sm:$0xf]  ;;  %v600_v9 = vld [vmem:[#allocation7 + $0x8] sm:$0xf0] }
  0x3e   : > { %346 = vmatpush.bf16.msra.mxu0 %v607_v3  ;;  %v599_v10 = vor.u32 %v619_v6, %v598_v5  ;;  %v383_v11 = vld [vmem:[#allocation8 + $0x78] sm:$0xff]  ;;  %v382_v13 = vld [vmem:[#allocation8 + $0x70] sm:$0xff]  ;;  %v603_v14 = vor.u32 %v618_v8, %v600_v9  ;;  %v381_v16 = vld [vmem:[#allocation8 + $0x68] sm:$0xff]  ;;  %vm336_vm0 = vcmask 261120   ;;  %s595_s21 = sshll.u32 %s1062_s12, 3  ;;  %s615_s14 = sshll.u32 %s922_s18, 3 }
  0x3f   : > { %v399_v12 = vld [vmem:[#allocation8 + $0xf8] sm:$0xff]  ;;  %359 = vmatpush.bf16.msra.mxu1 %v611_v7  ;;  %400 = vmatpush.msra.mxu2 %v383_v11  ;;  %v398_v15 = vld [vmem:[#allocation8 + $0xf0] sm:$0xff]  ;;  %v397_v17 = vld [vmem:[#allocation8 + $0xe8] sm:$0xff]  ;;  %s453_s30 = scalar_lea.hbm %s1133_s4, %s615_s14  ;;  %s303_s5 = scalar_lea.vmem [#allocation10], %s595_s21 }
  0x40   : > { %420 = vmatpush.msra.mxu3 %v399_v12  ;;  %v305_v18 = vld [vmem:[%s1066_s29] sm:$0xf]  ;;  %v380_v19 = vld [vmem:[#allocation8 + $0x60] sm:$0xff]  ;;  %v377_v25 = vld [vmem:[#allocation8 + $0x48] sm:$0xff]  ;;  %s455_s6 = sshll.u32 %s303_s5, 4  ;;  %s457_s7 = sshll.u32 %s453_s30, 4  ;;  %s456_s6 = int_to_ptr.vmem [resolvable:$true] %s455_s6  ;;  %s458_s7 = int_to_ptr.hbm [resolvable:$true] %s457_s7 }
  0x41   : > { %401 = vmatpush.msra.mxu2 %v382_v13  ;;  %v396_v20 = vld [vmem:[#allocation8 + $0xe0] sm:$0xff]  ;;  %v379_v21 = vld [vmem:[#allocation8 + $0x58] sm:$0xff]  ;;  %v378_v23 = vld [vmem:[#allocation8 + $0x50] sm:$0xff]  ;;  %s442_s8 = scalar_lea.sflag [#allocation4], %s1062_s12  ;;  %s850_s9 = sshra.s32 %s458_s7, 4  ;;  %s851_s9 = int_to_ptr.hbm [resolvable:$true] %s850_s9 }
  0x42   : > { %347 = vmatpush.bf16.msra.mxu0 %v599_v10  ;;  %421 = vmatpush.msra.mxu3 %v398_v15  ;;  %v395_v22 = vld [vmem:[#allocation8 + $0xd8] sm:$0xff]  ;;  %v394_v24 = vld [vmem:[#allocation8 + $0xd0] sm:$0xff]  ;;  %v393_v26 = vld [vmem:[#allocation8 + $0xc8] sm:$0xff]  ;;  %s852_s11 = scalar_lea.hbm %s851_s9, 8  ;;  %s856_s27 = scalar_lea.hbm %s1133_s4, 16 }
  0x43   : > { %360 = vmatpush.bf16.msra.mxu1 %v603_v14  ;;  %402 = vmatpush.msra.mxu2 %v381_v16  ;;  %v376_v27 = vld [vmem:[#allocation8 + $0x40] sm:$0xff]  ;;  %v375_v29 = vld [vmem:[#allocation8 + $0x38] sm:$0xff]  ;;  %v374_v31 = vld [vmem:[#allocation8 + $0x30] sm:$0xff]  ;;  %p853_p1 = scmp.ne.s32.totalorder %s851_s9, %s852_s11  ;;  %p857_p10 = scmp.lt.s32.totalorder %s851_s9, %s1133_s4 }
  0x44   : > { %422 = vmatpush.msra.mxu3 %v397_v17  ;;  %v392_v28 = vld [vmem:[#allocation8 + $0xc0] sm:$0xff]  ;;  %v391_v30 = vld [vmem:[#allocation8 + $0xb8] sm:$0xff]  ;;  %v390_v32 = vld [vmem:[#allocation8 + $0xb0] sm:$0xff]  ;;  %p858_p11 = scmp.lt.s32.totalorder %s856_s27, %s852_s11 }
  0x45   : > { %612 = vmatmul.msk.bf16.vlgmr.msra.gmra.mxu0 %vm336_vm0, %v305_v18  ;;  %403 = vmatpush.msra.mxu2 %v380_v19  ;;  %v373_v33 = vld [vmem:[#allocation8 + $0x28] sm:$0xff]  ;;  %v372_v35 = vld [vmem:[#allocation8 + $0x20] sm:$0xff]  ;;  %v371_v37 = vld [vmem:[#allocation8 + $0x18] sm:$0xff]  ;;  %p854_p3 = pnand %p853_p1, %p1035_p2 }
  0x46   : > { %613 = vmatmul.msk.bf16.vlgmr.msra.gmra.mxu1 %vm336_vm0, %v305_v18  ;;  %423 = vmatpush.msra.mxu3 %v396_v20  ;;  %v389_v34 = vld [vmem:[#allocation8 + $0xa8] sm:$0xff]  ;;  %v388_v36 = vld [vmem:[#allocation8 + $0xa0] sm:$0xff]  ;;  %v387_v38 = vld [vmem:[#allocation8 + $0x98] sm:$0xff]  ;;  %p859_p12 = por %p858_p11, %p857_p10 }
  0x47   : > { %404 = vmatpush.msra.mxu2 %v379_v21  ;;  %v370_v39 = vld [vmem:[#allocation8 + $0x10] sm:$0xff]  ;;  %v369_v41 = vld [vmem:[#allocation8 + $0x8] sm:$0xff]  ;;  %v368_v43 = vld [vmem:[#allocation8] sm:$0xff]  ;;  %p855_p9 = pneg %p854_p3 }
  0x48   : > { %424 = vmatpush.msra.mxu3 %v395_v22  ;;  %v386_v40 = vld [vmem:[#allocation8 + $0x90] sm:$0xff]  ;;  %v385_v42 = vld [vmem:[#allocation8 + $0x88] sm:$0xff]  ;;  %v384_v44 = vld [vmem:[#allocation8 + $0x80] sm:$0xff] }
  0x49   : > { %405 = vmatpush.msra.mxu2 %v378_v23  ;;  %v306_v45 = vld [vmem:[%s1074_s10] sm:$0x3]  ;;  %p860_p13 = pnand %p859_p12, %p855_p9 }
  0x4a   : > { %425 = vmatpush.msra.mxu3 %v394_v24  ;;  %v312_v46 = vperm.slane %v306_v45, 0  ;;  %v313_v47 = vperm.slane %v306_v45, 1 }
  0x4b   : > { %406 = vmatpush.msra.mxu2 %v377_v25 }
  0x4c   : > { %426 = vmatpush.msra.mxu3 %v393_v26 }
  0x4d   : > { %407 = vmatpush.msra.mxu2 %v376_v27 }
  0x4e   : > { %427 = vmatpush.msra.mxu3 %v392_v28 }
  0x4f   : > { %408 = vmatpush.msra.mxu2 %v375_v29 }
  0x50   : > { %428 = vmatpush.msra.mxu3 %v391_v30 }
  0x51   : > { %409 = vmatpush.msra.mxu2 %v374_v31 }
  0x52   : > { %429 = vmatpush.msra.mxu3 %v390_v32 }
  0x53   : > { %410 = vmatpush.msra.mxu2 %v373_v33 }
  0x54   : > { %430 = vmatpush.msra.mxu3 %v389_v34 }
  0x55   : > { %411 = vmatpush.msra.mxu2 %v372_v35 }
  0x56   : > { %431 = vmatpush.msra.mxu3 %v388_v36 }
  0x57   : > { %412 = vmatpush.msra.mxu2 %v371_v37 }
  0x58   : > { %432 = vmatpush.msra.mxu3 %v387_v38 }
  0x59   : > { %413 = vmatpush.msra.mxu2 %v370_v39 }
  0x5a   : > { %433 = vmatpush.msra.mxu3 %v386_v40 }
  0x5b   : > { %414 = vmatpush.msra.mxu2 %v369_v41 }
  0x5c   : > { %434 = vmatpush.msra.mxu3 %v385_v42 }
  0x5d   : > { %415 = vmatpush.msra.mxu2 %v368_v43 }
  0x5e   : > { %435 = vmatpush.msra.mxu3 %v384_v44 }
  0xc2   : > { %v349_v48 = vpop.f32.mrf.mxu0 }
  0xc3   : > { %v350_v49 = vadd.f32 %v349_v48, %v312_v46  ;;  %v362_v50 = vpop.f32.mrf.mxu1 }
  0xc4   : > { %v363_v51 = vadd.f32 %v362_v50, %v313_v47 }
  0xc5   : > { %712 = vtanh.f32 %v350_v49 }
  0xc6   : > { %714 = vtanh.f32 %v363_v51 }
  0xca   : > { %v351_v52 = vpop.f32.mrf.mxu0 }
  0xcb   : > { %v713_v53 = vpop.eup %712  ;;  %v364_v54 = vpop.f32.mrf.mxu1 }
  0xcc   : > { %v715_v55 = vpop.eup %714  ;;  %416 = vmatmul.f32.vlgmr.msra.gmra.mxu2 %v713_v53 }
  0xcd   : > { %436 = vmatmul.f32.vlgmr.msra.gmra.mxu3 %v715_v55 }
 0x14f   : > { %v417_v56 = vpop.f32.mrf.mxu2 }
 0x150   : > { %v437_v57 = vpop.f32.mrf.mxu3 }
 0x151   : > { %v438_v58 = vadd.f32 %v437_v57, %v417_v56 }
 0x153   : > { %440 = vst [vmem:[%s303_s5] sm:$0xff] %v438_v58 }
 0x154   : > { %863 = shalt.err (!%p860_p13)
}
 0x155   : > { %634 = dma.vmem_to_hbm [thread:$0]  (%p1035_p2), %s456_s6, 128, %s458_s7, %s442_s8  }
 0x156 PF: > { %s469_s3 = sand.u32 1, %s910_s15   ;;  %p651_p0 = pnand %p585_p6, %p1042_p5 }
 0x157   : > { %s470_s29 = scalar_lea.sflag [#allocation4], %s469_s3 }
 0x158   : > { %p652_p4 = pneg %p651_p0 }
 0x15a   : > { %905 = dma.done.wait (%p652_p4), %s470_s29, 128  }
 0x15b   : > { %907 = vsyncadd (%p652_p4), %s470_s29, 4294967168  ;;  %s24_s20 = sadd.s32 1, %s930_s20   ;;  %s1151_s2 = sld [smem:[#allocation16_spill]] }
 0x15c   : > { %p21_p7 = scmp.ge.s32.totalorder %s24_s20, 4   ;;  %s1152_s17 = sld [smem:[#allocation18_spill]] }
 0x15d   : > { %s1153_s22 = sld [smem:[#allocation17_spill]]  ;;  %s1154_s15 = smov %s914_s16 }
 0x15e   : > { %s1156_s18 = smov %s926_s19 }
 0x15f   :  { %23 = sbr.rel (!%p21_p7) target bundleno = 12 (0xc), region = 102 }
 0x161   : > { %s1155_s16 = smov %s1151_s2 }
 0x163   : > { %s1157_s19 = smov %s1153_s22 }
 0x164   :  { %476 = vsyncpa [#allocation3], 1 }
 0x165   :  { %478 = vsyncpa [#allocation3 + $0x1], 1 }
 0x166   :  { %479 = vsyncpa [#allocation6], 1 }
 0x167   :  { %481 = vsyncpa [#allocation6 + $0x1], 1 }
 0x168   :  { %482 = vsyncpa [#allocation9], 1 }
 0x169   :  { %483 = vsyncpa [#allocation4], 1 }
 0x16a   :  { %485 = vsyncpa [#allocation4 + $0x1], 1 }

</bundles_post_ra>
